<compile_context>
chip_gen: v7x
topology: tpu7x:2x2x1
jax: 0.10.0
libtpu: 0.0.40
codegen_flags: <defaults>
</compile_context>

<pallas_src>
import jax
import jax.numpy as jnp
from jax.experimental import pallas as pl
from jax.experimental.pallas import tpu as pltpu

# ---- small, self-consistent stand-in shapes --------------------------------
B = 2                      # real batch
B_PAD = 8                  # padded batch (f32 sublane multiple)
C, H, W = 4, 16, 16        # image (NCHW)
FEAT_IN = C * H * W        # flattened image features (1024)
D = 32                     # in_planes (stand-in for 768)
NUM_CLASSES = 8            # num_classes
NUM_RES = 5                # resolution classes (fixed = 5 in the module)
LOGITS = NUM_CLASSES + NUM_RES
PAD = 128                  # lane-dense padding for feature / logit slabs
BN_EPS = 1e-5              # nn.BatchNorm1d default eps


# ----------------------------------------------------------------------------
# Fused kernel: backbone-stub projection -> BatchNorm1d (train) -> classifiers.
#
# TODO(synk): the real backbone (`self.base`) is an external TransReID ViT
# supplied via `factory[cfg.MODEL.TRANSFORMER_TYPE]`; it has no clean in-scope
# Pallas equivalent, so a deterministic linear projection stands in for it.
# Only the head (BN bottleneck + the two bias-free classifiers) is faithful.
# TODO(synk): BatchNorm1d's running_mean/running_var momentum update (a
# training-mode side effect) is not modeled; forward outputs are unaffected.
# ----------------------------------------------------------------------------
def fused_kernel(x_ref, wg_ref, w_all_ref, out_ref):
    # Backbone stub: bf16 MXU matmul, f32 accumulation.  wg is zero-padded to
    # 128 output lanes, so g is a lane-dense (B_PAD, PAD) f32 slab whose first
    # D columns are the real global_feat; pad columns and pad rows are exactly
    # zero (zero weights / zero input rows).
    g = jnp.dot(x_ref[...], wg_ref[...],
                preferred_element_type=jnp.float32)           # (B_PAD, PAD) f32

    # global_feat (pre-BN) -> columns [0, PAD) of the merged output slab.
    out_ref[:, 0:PAD] = g

    # BatchNorm1d, training mode: biased batch variance over the REAL batch
    # only.  Padded rows of g are exactly zero, so sums over B_PAD rows divided
    # by the real B give the exact batch statistics (E[x^2] - E[x]^2 form).
    inv_b = 1.0 / B
    mean = jnp.sum(g, axis=0, keepdims=True) * inv_b
    e_x2 = jnp.sum(g * g, axis=0, keepdims=True) * inv_b
    var = e_x2 - mean * mean
    inv = jax.lax.rsqrt(var + BN_EPS)
    # gamma is folded into w_all host-side; beta == 0 (frozen), so no bias term.
    feat = (g - mean) * inv                                   # (B_PAD, PAD) f32

    # Both bias-free classifiers in ONE bf16 MXU pass: w_all is the zero-padded
    # gamma-folded concatenation [gamma*W_cls^T | gamma*W_res^T], bf16.
    logits = jnp.dot(feat.astype(jnp.bfloat16), w_all_ref[...],
                     preferred_element_type=jnp.float32)      # (B_PAD, PAD) f32
    out_ref[:, PAD:2 * PAD] = logits


def forward(x_nchw, params):
    # Glue: NCHW -> flat (B, FEAT_IN), bf16 for the backbone-stub MXU pass,
    # padded with zero rows to B_PAD so all stores are full-sublane.
    x_flat = x_nchw.reshape(B, FEAT_IN).astype(jnp.bfloat16)
    x_pad = jnp.zeros((B_PAD, FEAT_IN), jnp.bfloat16).at[:B, :].set(x_flat)

    full = lambda shape: pl.BlockSpec(shape, lambda i: (0, 0))
    slab = pl.pallas_call(
        fused_kernel,
        out_shape=jax.ShapeDtypeStruct((B_PAD, 2 * PAD), jnp.float32),
        grid=(1,),
        in_specs=[full((B_PAD, FEAT_IN)),   # x (bf16, zero-padded rows)
                  full((FEAT_IN, PAD)),     # backbone-stub weight (bf16, padded)
                  full((PAD, PAD))],        # gamma-folded [W_cls^T | W_res^T] (bf16)
        out_specs=full((B_PAD, 2 * PAD)),   # merged [global_feat | logits] slab
        compiler_params=pltpu.CompilerParams(
            dimension_semantics=("arbitrary",)),
    )(x_pad, params["wg_pad"], params["w_all_pad"])

    # Slice the lane-dense slab back to the module's shapes (free, wrapper-side).
    global_feat = slab[:B, :D]
    cls_score = slab[:B, PAD:PAD + NUM_CLASSES]
    cls_res = slab[:B, PAD + NUM_CLASSES:PAD + LOGITS]
    return cls_score, global_feat, cls_res


def init_params(key):
    k1, k2, k3 = jax.random.split(key, 3)

    # Backbone-stub projection (deterministic stand-in for the ViT backbone),
    # zero-padded to 128 output lanes, bf16 for the MXU.
    wg = jax.random.normal(k1, (FEAT_IN, D), jnp.float32) * (1.0 / FEAT_IN ** 0.5)
    wg_pad = jnp.zeros((FEAT_IN, PAD), jnp.float32).at[:, :D].set(wg)
    wg_pad = wg_pad.astype(jnp.bfloat16)

    # Classifier weights: weights_init_classifier -> normal(std=0.001), no bias.
    w_cls = jax.random.normal(k2, (NUM_CLASSES, D), jnp.float32) * 0.001
    w_res = jax.random.normal(k3, (NUM_RES, D), jnp.float32) * 0.001

    # BatchNorm bottleneck affine params: weights_init_kaiming -> gamma=1,
    # beta=0 (beta is also requires_grad_(False) in the module).  gamma is
    # folded into the classifier panel here; beta == 0 so its bias term
    # (beta @ W^T) vanishes exactly.
    gamma = jnp.ones((D,), jnp.float32)

    # Packed, gamma-folded, pre-transposed single (PAD, PAD) bf16 panel:
    #   columns [0, NUM_CLASSES)        -> gamma * W_cls^T
    #   columns [NUM_CLASSES, LOGITS)   -> gamma * W_res^T
    w_all = jnp.zeros((PAD, PAD), jnp.float32)
    w_all = w_all.at[:D, :NUM_CLASSES].set(gamma[:, None] * w_cls.T)
    w_all = w_all.at[:D, NUM_CLASSES:LOGITS].set(gamma[:, None] * w_res.T)
    w_all_pad = w_all.astype(jnp.bfloat16)

    return {"wg_pad": wg_pad, "w_all_pad": w_all_pad}


if __name__ == "__main__":
    key = jax.random.PRNGKey(0)
    pkey, xkey = jax.random.split(key)
    params = init_params(pkey)
    x = jax.random.normal(xkey, (B, C, H, W), jnp.float32)    # NCHW like torch

    cls_score, global_feat, cls_res = jax.block_until_ready(
        jax.jit(forward)(x, params))

    assert cls_score.shape == (B, NUM_CLASSES)
    assert global_feat.shape == (B, D)
    assert cls_res.shape == (B, NUM_RES)
    assert bool(jnp.all(jnp.isfinite(cls_score)))
    assert bool(jnp.all(jnp.isfinite(global_feat)))
    assert bool(jnp.all(jnp.isfinite(cls_res)))
    print("KERNEL_OK")
</pallas_src>

<mosaic_0001>
module attributes {stable_mosaic.version = 11 : i64} {
  func.func @fused_kernel(%arg0: i32, %arg1: memref<8x1024xbf16, #tpu.memory_space<vmem>>, %arg2: memref<1024x128xbf16, #tpu.memory_space<vmem>>, %arg3: memref<128x128xbf16, #tpu.memory_space<vmem>>, %arg4: memref<8x256xf32, #tpu.memory_space<vmem>>) attributes {dimension_semantics = [#tpu.dimension_semantics<arbitrary>], iteration_bounds = array<i64: 1>, scalar_prefetch = 0 : i64, scratch_operands = 0 : i64, tpu.core_type = #tpu.core_type<tc>, window_params = [{pipeline_mode = #tpu.pipeline_mode<synchronous>, transform_indices = @transform_0, window_bounds = array<i64: 8, 1024>}, {pipeline_mode = #tpu.pipeline_mode<synchronous>, transform_indices = @transform_1, window_bounds = array<i64: 1024, 128>}, {pipeline_mode = #tpu.pipeline_mode<synchronous>, transform_indices = @transform_2, window_bounds = array<i64: 128, 128>}, {pipeline_mode = #tpu.pipeline_mode<synchronous>, transform_indices = @transform_3, window_bounds = array<i64: 8, 256>}]} {
    %c0 = arith.constant 0 : index
    %c0_0 = arith.constant 0 : index
    %0 = vector.load %arg1[%c0, %c0_0] : memref<8x1024xbf16, #tpu.memory_space<vmem>>, vector<8x1024xbf16>
    %c0_1 = arith.constant 0 : index
    %c0_2 = arith.constant 0 : index
    %1 = vector.load %arg2[%c0_1, %c0_2] : memref<1024x128xbf16, #tpu.memory_space<vmem>>, vector<1024x128xbf16>
    %cst = arith.constant dense<0.000000e+00> : vector<8x128xf32>
    %2 = tpu.matmul %0, %1, %cst {dimension_numbers = #tpu.dot_dimension_numbers<[1], [0], [0], [1], [0, 0, 1, 1], [], []>} : vector<8x1024xbf16>, vector<1024x128xbf16>, vector<8x128xf32> -> vector<8x128xf32>
    %c0_3 = arith.constant 0 : index
    %c0_4 = arith.constant 0 : index
    %3 = vector.load %arg4[%c0_3, %c0_4] : memref<8x256xf32, #tpu.memory_space<vmem>>, vector<8x128xf32>
    tpu.vector_store %arg4[%c0_3, %c0_4], %2 {strides = array<i32>} : memref<8x256xf32, #tpu.memory_space<vmem>>, vector<8x128xf32>,
    %cst_5 = arith.constant dense<0.000000e+00> : vector<128xf32>
    %4 = vector.multi_reduction <add>, %2, %cst_5 [0] : vector<8x128xf32> to vector<128xf32>
    %5 = vector.shape_cast %4 : vector<128xf32> to vector<1x128xf32>
    %cst_6 = arith.constant 5.000000e-01 : f32
    %6 = vector.broadcast %cst_6 : f32 to vector<1x128xf32>
    %7 = arith.mulf %5, %6 : vector<1x128xf32>
    %8 = arith.mulf %2, %2 : vector<8x128xf32>
    %cst_7 = arith.constant dense<0.000000e+00> : vector<128xf32>
    %9 = vector.multi_reduction <add>, %8, %cst_7 [0] : vector<8x128xf32> to vector<128xf32>
    %10 = vector.shape_cast %9 : vector<128xf32> to vector<1x128xf32>
    %cst_8 = arith.constant 5.000000e-01 : f32
    %11 = vector.broadcast %cst_8 : f32 to vector<1x128xf32>
    %12 = arith.mulf %10, %11 : vector<1x128xf32>
    %13 = arith.mulf %7, %7 : vector<1x128xf32>
    %14 = arith.subf %12, %13 : vector<1x128xf32>
    %cst_9 = arith.constant 9.99999974E-6 : f32
    %15 = vector.broadcast %cst_9 : f32 to vector<1x128xf32>
    %16 = arith.addf %14, %15 : vector<1x128xf32>
    %17 = math.rsqrt %16 : vector<1x128xf32>
    %18 = vector.broadcast %7 : vector<1x128xf32> to vector<8x128xf32>
    %19 = arith.subf %2, %18 : vector<8x128xf32>
    %20 = vector.broadcast %17 : vector<1x128xf32> to vector<8x128xf32>
    %21 = arith.mulf %19, %20 : vector<8x128xf32>
    %22 = arith.truncf %21 : vector<8x128xf32> to vector<8x128xbf16>
    %c0_10 = arith.constant 0 : index
    %c0_11 = arith.constant 0 : index
    %23 = vector.load %arg3[%c0_10, %c0_11] : memref<128x128xbf16, #tpu.memory_space<vmem>>, vector<128x128xbf16>
    %cst_12 = arith.constant dense<0.000000e+00> : vector<8x128xf32>
    %24 = tpu.matmul %22, %23, %cst_12 {dimension_numbers = #tpu.dot_dimension_numbers<[1], [0], [0], [1], [0, 0, 1, 1], [], []>} : vector<8x128xbf16>, vector<128x128xbf16>, vector<8x128xf32> -> vector<8x128xf32>
    %c0_13 = arith.constant 0 : index
    %c128 = arith.constant 128 : index
    %25 = vector.load %arg4[%c0_13, %c128] : memref<8x256xf32, #tpu.memory_space<vmem>>, vector<8x128xf32>
    tpu.vector_store %arg4[%c0_13, %c128], %24 {strides = array<i32>} : memref<8x256xf32, #tpu.memory_space<vmem>>, vector<8x128xf32>,
    return
  }
  func.func @transform_0(%arg0: i32) -> (i32, i32) {
    %c0_i32 = arith.constant 0 : i32
    %c0_i32_0 = arith.constant 0 : i32
    %c0_i32_1 = arith.constant 0 : i32
    return %c0_i32, %c0_i32_0 : i32, i32
  }
  func.func @transform_1(%arg0: i32) -> (i32, i32) {
    %c0_i32 = arith.constant 0 : i32
    %c0_i32_0 = arith.constant 0 : i32
    %c0_i32_1 = arith.constant 0 : i32
    return %c0_i32, %c0_i32_0 : i32, i32
  }
  func.func @transform_2(%arg0: i32) -> (i32, i32) {
    %c0_i32 = arith.constant 0 : i32
    %c0_i32_0 = arith.constant 0 : i32
    %c0_i32_1 = arith.constant 0 : i32
    return %c0_i32, %c0_i32_0 : i32, i32
  }
  func.func @transform_3(%arg0: i32) -> (i32, i32) {
    %c0_i32 = arith.constant 0 : i32
    %c0_i32_0 = arith.constant 0 : i32
    %c0_i32_1 = arith.constant 0 : i32
    return %c0_i32, %c0_i32_0 : i32, i32
  }
}

</mosaic_0001>

<bundles_post_ra>
// kernel: forward.1
= control target key start
LH: loop header
LB: loop body
LE: loop exit
PB: predicated region body
PF: predicated region fallthrough
CT: control target
= control target key end

     0   :  { %8 = vsyncpa [#allocation3], 0  ;;  %s1174_s12 = smov [#allocation2]   ;;  %s1253_s0 = inlined_call_operand.vmem [shape: bf16[8,1024], index: 0, kind: input, shape index: {}]   ;;  %s1254_s1 = inlined_call_operand.hbm [shape: bf16[1024,128], index: 1, kind: input, shape index: {}]   ;;  %s1255_s2 = inlined_call_operand.vmem [shape: bf16[128,128], index: 2, kind: input, shape index: {}]   ;;  %s1256_s3 = inlined_call_operand.vmem [shape: f32[8,256], index: 3, kind: output, shape index: {}]  }
   0x1   :  { %s16_s13 = sshll.u32 %s1174_s12, 4  ;;  %s1150_s16 = scalar_lea.hbm %s1254_s1, 8192  ;;  %s17_s13 = int_to_ptr.vmem [resolvable:$true] %s16_s13 }
   0x2   :  { %p1151_p0 = scmp.ne.s32.totalorder %s1254_s1, %s1150_s16  ;;  %p1154_p1 = scmp.lt.u32.totalorder %s1150_s16, %s1254_s1 }
   0x4   :  { %p1156_p2 = pnand %p1154_p1, %p1151_p0 }
   0x6   :  { %1159 = shalt.err (!%p1156_p2)
}
   0x7   :  { %s1160_s21 = scalar_lea.vmem %s17_s13, 8192  ;;  %p1165_p4 = scmp.lt.s32.totalorder %s17_s13, %s17_s13 }
   0x8   :  { %p1161_p3 = scmp.ne.s32.totalorder %s17_s13, %s1160_s21  ;;  %p1166_p5 = scmp.lt.s32.totalorder %s1160_s21, %s1160_s21 }
   0xa   :  { %p1167_p6 = por %p1166_p5, %p1165_p4 }
   0xc   :  { %p1168_p7 = pnand %p1167_p6, %p1161_p3 }
   0xe   :  { %1171 = shalt.err (!%p1168_p7)
}
   0xf   :  { %s1175_s22 = smov 64   ;;  %s1176_s23 = smov 4  }
  0x10   :  { %22 = dma.hbm_to_vmem [thread:$0]  %s1254_s1, 8192, %s17_s13, [#allocation3], %s1175_s22, %s1175_s22, %s1176_s23  }
  0x11   :  { %1172 = dma.done.wait [#allocation3], 8192  }
  0x12   :  { %1173 = vsyncadd [#allocation3], 4294959104  ;;  %v1068_v0 = vld [vmem:[#allocation2 + $0x40] sm:$0xff]   ;;  %v1072_v4 = vld [vmem:[#allocation2 + $0x48] sm:$0xff]   ;;  %vm1178_vm0 = vmmov 0  }
  0x13   :  { %v1069_v1 = vld [vmem:[#allocation2 + $0xc0] sm:$0xff]   ;;  %946 = vmatprep.subr.bf16.mxu0 %v1068_v0  ;;  %v1073_v5 = vld [vmem:[#allocation2 + $0xc8] sm:$0xff]   ;;  %v1076_v8 = vld [vmem:[#allocation2 + $0x50] sm:$0xff]  }
  0x14   :  { %v1070_v2 = vld [vmem:[#allocation2] sm:$0xff]   ;;  %968 = vmatprep.subr.bf16.mxu1 %v1069_v1  ;;  %v1074_v6 = vld [vmem:[#allocation2 + $0x8] sm:$0xff]   ;;  %v1077_v9 = vld [vmem:[#allocation2 + $0xd0] sm:$0xff]  }
  0x15   :  { %v1071_v3 = vld [vmem:[#allocation2 + $0x80] sm:$0xff]   ;;  %947 = vmatpush3.bf16.msra.mxu0 %v1070_v2  ;;  %v1075_v7 = vld [vmem:[#allocation2 + $0x88] sm:$0xff]   ;;  %v1078_v10 = vld [vmem:[#allocation2 + $0x10] sm:$0xff]  }
  0x16   :  { %969 = vmatpush3.bf16.msra.mxu1 %v1071_v3  ;;  %948 = vmatprep.subr.bf16.mxu0 %v1072_v4  ;;  %v1079_v11 = vld [vmem:[#allocation2 + $0x90] sm:$0xff]   ;;  %v1080_v12 = vld [vmem:[#allocation2 + $0x58] sm:$0xff]   ;;  %v1084_v16 = vld [vmem:[#allocation2 + $0x60] sm:$0xff]  }
  0x17   :  { %970 = vmatprep.subr.bf16.mxu1 %v1073_v5  ;;  %v1081_v13 = vld [vmem:[#allocation2 + $0xd8] sm:$0xff]   ;;  %v1085_v17 = vld [vmem:[#allocation2 + $0xe0] sm:$0xff]   ;;  %v1088_v20 = vld [vmem:[#allocation2 + $0x68] sm:$0xff]  }
  0x18   :  { %v1082_v14 = vld [vmem:[#allocation2 + $0x18] sm:$0xff]   ;;  %v1086_v18 = vld [vmem:[#allocation2 + $0x20] sm:$0xff]   ;;  %v1089_v21 = vld [vmem:[#allocation2 + $0xe8] sm:$0xff]  }
  0x19   :  { %949 = vmatpush3.bf16.msra.mxu0 %v1074_v6  ;;  %v1083_v15 = vld [vmem:[#allocation2 + $0x98] sm:$0xff]   ;;  %v1087_v19 = vld [vmem:[#allocation2 + $0xa0] sm:$0xff]   ;;  %v1090_v22 = vld [vmem:[#allocation2 + $0x28] sm:$0xff]  }
  0x1a   :  { %971 = vmatpush3.bf16.msra.mxu1 %v1075_v7  ;;  %950 = vmatprep.subr.bf16.mxu0 %v1076_v8  ;;  %v1091_v23 = vld [vmem:[#allocation2 + $0xa8] sm:$0xff]   ;;  %v1092_v24 = vld [vmem:[#allocation2 + $0x70] sm:$0xff]   ;;  %v1096_v28 = vld [vmem:[#allocation2 + $0x78] sm:$0xff]  }
  0x1b   :  { %972 = vmatprep.subr.bf16.mxu1 %v1077_v9  ;;  %v1093_v25 = vld [vmem:[#allocation2 + $0xf0] sm:$0xff]   ;;  %v1097_v29 = vld [vmem:[#allocation2 + $0xf8] sm:$0xff]   ;;  %v29_v32 = vld [vmem:[%s1253_s0] sm:$0xff] }
  0x1c   :  { %v1094_v26 = vld [vmem:[#allocation2 + $0x30] sm:$0xff]   ;;  %v1098_v30 = vld [vmem:[#allocation2 + $0x38] sm:$0xff]   ;;  %v30_v33 = vld [vmem:[%s1253_s0 + $0x8] sm:$0xff]  ;;  %v866_v34 = vcombine.low %v29_v32, %v29_v32  ;;  %v867_v35 = vcombine.high %v29_v32, %v29_v32 }
  0x1d   :  { %951 = vmatpush3.bf16.msra.mxu0 %v1078_v10  ;;  %v1095_v27 = vld [vmem:[#allocation2 + $0xb0] sm:$0xff]   ;;  %v1099_v31 = vld [vmem:[#allocation2 + $0xb8] sm:$0xff]   ;;  %v868_v36 = vcombine.low %v30_v33, %v30_v33  ;;  %v869_v37 = vcombine.high %v30_v33, %v30_v33  ;;  %v1104_v38 = vld [vmem:[#allocation2 + $0x140] sm:$0xff]  }
  0x1e   :  { %973 = vmatpush3.bf16.msra.mxu1 %v1079_v11  ;;  %952 = vmatprep.subr.bf16.mxu0 %v1080_v12  ;;  %v1105_v39 = vld [vmem:[#allocation2 + $0x1c0] sm:$0xff]   ;;  %v1108_v42 = vld [vmem:[#allocation2 + $0x148] sm:$0xff]   ;;  %v1112_v46 = vld [vmem:[#allocation2 + $0x150] sm:$0xff]  }
  0x1f   :  { %974 = vmatprep.subr.bf16.mxu1 %v1081_v13  ;;  %605 = vmatprep.mubr.bf16.mxu0 %v867_v35  ;;  %v1106_v40 = vld [vmem:[#allocation2 + $0x100] sm:$0xff]   ;;  %v1109_v43 = vld [vmem:[#allocation2 + $0x1c8] sm:$0xff]   ;;  %v1113_v47 = vld [vmem:[#allocation2 + $0x1d0] sm:$0xff]   ;;  %v1177_v13 = vmov 0.0  }
  0x20   :  { %645 = vmatprep.mubr.bf16.mxu1 %v869_v37  ;;  %v1107_v41 = vld [vmem:[#allocation2 + $0x180] sm:$0xff]   ;;  %v1110_v44 = vld [vmem:[#allocation2 + $0x108] sm:$0xff]   ;;  %v1114_v48 = vld [vmem:[#allocation2 + $0x110] sm:$0xff]  }
  0x21   :  { %953 = vmatpush3.bf16.msra.mxu0 %v1082_v14  ;;  %v1111_v45 = vld [vmem:[#allocation2 + $0x188] sm:$0xff]   ;;  %v1115_v49 = vld [vmem:[#allocation2 + $0x190] sm:$0xff]   ;;  %v1116_v50 = vld [vmem:[#allocation2 + $0x158] sm:$0xff]  }
  0x22   :  { %975 = vmatpush3.bf16.msra.mxu1 %v1083_v15  ;;  %954 = vmatprep.subr.bf16.mxu0 %v1084_v16  ;;  %v1117_v51 = vld [vmem:[#allocation2 + $0x1d8] sm:$0xff]   ;;  %v1120_v54 = vld [vmem:[#allocation2 + $0x160] sm:$0xff]   ;;  %v1124_v58 = vld [vmem:[#allocation2 + $0x168] sm:$0xff]  }
  0x23   :  { %976 = vmatprep.subr.bf16.mxu1 %v1085_v17  ;;  %v1118_v52 = vld [vmem:[#allocation2 + $0x118] sm:$0xff]   ;;  %v1121_v55 = vld [vmem:[#allocation2 + $0x1e0] sm:$0xff]   ;;  %v1125_v59 = vld [vmem:[#allocation2 + $0x1e8] sm:$0xff]  }
  0x24   :  { %v1119_v53 = vld [vmem:[#allocation2 + $0x198] sm:$0xff]   ;;  %v1122_v56 = vld [vmem:[#allocation2 + $0x120] sm:$0xff]   ;;  %v1126_v60 = vld [vmem:[#allocation2 + $0x128] sm:$0xff]  }
  0x25   :  { %955 = vmatpush3.bf16.msra.mxu0 %v1086_v18  ;;  %v1123_v57 = vld [vmem:[#allocation2 + $0x1a0] sm:$0xff]   ;;  %v1127_v61 = vld [vmem:[#allocation2 + $0x1a8] sm:$0xff]   ;;  %v1128_v62 = vld [vmem:[#allocation2 + $0x170] sm:$0xff]  }
  0x26   :  { %977 = vmatpush3.bf16.msra.mxu1 %v1087_v19  ;;  %956 = vmatprep.subr.bf16.mxu0 %v1088_v20  ;;  %v1129_v63 = vld [vmem:[#allocation2 + $0x1f0] sm:$0xff]   ;;  %v1132_v2 = vld [vmem:[#allocation2 + $0x178] sm:$0xff]   ;;  %v1140_v12 = vld [vmem:[%s1255_s2] sm:$0xff]  }
  0x27   :  { %978 = vmatprep.subr.bf16.mxu1 %v1089_v21  ;;  %v1130_v0 = vld [vmem:[#allocation2 + $0x130] sm:$0xff]   ;;  %v1133_v3 = vld [vmem:[#allocation2 + $0x1f8] sm:$0xff]   ;;  %v1141_v14 = vld [vmem:[%s1255_s2 + $0x8] sm:$0xff]  }
  0x28   :  { %v1131_v1 = vld [vmem:[#allocation2 + $0x1b0] sm:$0xff]   ;;  %v1134_v4 = vld [vmem:[#allocation2 + $0x138] sm:$0xff]   ;;  %v1144_v17 = vld [vmem:[%s1255_s2 + $0x20] sm:$0xff]  }
  0x29   :  { %957 = vmatpush3.bf16.msra.mxu0 %v1090_v22  ;;  %v1135_v5 = vld [vmem:[#allocation2 + $0x1b8] sm:$0xff]   ;;  %v31_v6 = vld [vmem:[%s1253_s0 + $0x10] sm:$0xff]  ;;  %v1145_v18 = vld [vmem:[%s1255_s2 + $0x28] sm:$0xff]  }
  0x2a   :  { %979 = vmatpush3.bf16.msra.mxu1 %v1091_v23  ;;  %958 = vmatprep.subr.bf16.mxu0 %v1092_v24  ;;  %v870_v7 = vcombine.low %v31_v6, %v31_v6  ;;  %v871_v8 = vcombine.high %v31_v6, %v31_v6  ;;  %v32_v9 = vld [vmem:[%s1253_s0 + $0x18] sm:$0xff]  ;;  %v1142_v15 = vld [vmem:[%s1255_s2 + $0x10] sm:$0xff]  }
  0x2b   :  { %980 = vmatprep.subr.bf16.mxu1 %v1093_v25  ;;  %v872_v10 = vcombine.low %v32_v9, %v32_v9  ;;  %v873_v11 = vcombine.high %v32_v9, %v32_v9  ;;  %v1143_v16 = vld [vmem:[%s1255_s2 + $0x18] sm:$0xff]   ;;  %v1146_v19 = vld [vmem:[%s1255_s2 + $0x30] sm:$0xff]  }
  0x2c   :  { %v1147_v20 = vld [vmem:[%s1255_s2 + $0x38] sm:$0xff]  }
  0x2d   :  { %959 = vmatpush3.bf16.msra.mxu0 %v1094_v26 }
  0x2e   :  { %981 = vmatpush3.bf16.msra.mxu1 %v1095_v27  ;;  %960 = vmatprep.subr.bf16.mxu0 %v1096_v28 }
  0x2f   :  { %982 = vmatprep.subr.bf16.mxu1 %v1097_v29 }
  0x31   :  { %961 = vmatpush3.bf16.msra.mxu0 %v1098_v30 }
  0x32   :  { %983 = vmatpush3.bf16.msra.mxu1 %v1099_v31  ;;  %990 = vmatprep.subr.bf16.mxu0 %v1104_v38 }
  0x33   :  { %1012 = vmatprep.subr.bf16.mxu1 %v1105_v39 }
  0x34   :  { %606 = vmatmul.mubr.bf16.vlgmr.msra.gmra.mrb[0].mxu0 %v866_v34 }
  0x35   :  { %646 = vmatmul.mubr.bf16.vlgmr.msra.gmra.mrb[0].mxu1 %v868_v36  ;;  %991 = vmatpush3.bf16.msra.mxu0 %v1106_v40 }
  0x36   :  { %1013 = vmatpush3.bf16.msra.mxu1 %v1107_v41  ;;  %992 = vmatprep.subr.bf16.mxu0 %v1108_v42 }
  0x37   :  { %1014 = vmatprep.subr.bf16.mxu1 %v1109_v43  ;;  %685 = vmatprep.mubr.bf16.mxu0 %v871_v8 }
  0x38   :  { %725 = vmatprep.mubr.bf16.mxu1 %v873_v11 }
  0x39   :  { %993 = vmatpush3.bf16.msra.mxu0 %v1110_v44 }
  0x3a   :  { %1015 = vmatpush3.bf16.msra.mxu1 %v1111_v45  ;;  %994 = vmatprep.subr.bf16.mxu0 %v1112_v46 }
  0x3b   :  { %1016 = vmatprep.subr.bf16.mxu1 %v1113_v47 }
  0x3d   :  { %995 = vmatpush3.bf16.msra.mxu0 %v1114_v48 }
  0x3e   :  { %1017 = vmatpush3.bf16.msra.mxu1 %v1115_v49  ;;  %996 = vmatprep.subr.bf16.mxu0 %v1116_v50 }
  0x3f   :  { %1018 = vmatprep.subr.bf16.mxu1 %v1117_v51 }
  0x41   :  { %997 = vmatpush3.bf16.msra.mxu0 %v1118_v52 }
  0x42   :  { %1019 = vmatpush3.bf16.msra.mxu1 %v1119_v53  ;;  %998 = vmatprep.subr.bf16.mxu0 %v1120_v54 }
  0x43   :  { %1020 = vmatprep.subr.bf16.mxu1 %v1121_v55 }
  0x45   :  { %999 = vmatpush3.bf16.msra.mxu0 %v1122_v56 }
  0x46   :  { %1021 = vmatpush3.bf16.msra.mxu1 %v1123_v57  ;;  %1000 = vmatprep.subr.bf16.mxu0 %v1124_v58 }
  0x47   :  { %1022 = vmatprep.subr.bf16.mxu1 %v1125_v59 }
  0x49   :  { %1001 = vmatpush3.bf16.msra.mxu0 %v1126_v60 }
  0x4a   :  { %1023 = vmatpush3.bf16.msra.mxu1 %v1127_v61  ;;  %1002 = vmatprep.subr.bf16.mxu0 %v1128_v62 }
  0x4b   :  { %1024 = vmatprep.subr.bf16.mxu1 %v1129_v63 }
  0x4d   :  { %1003 = vmatpush3.bf16.msra.mxu0 %v1130_v0 }
  0x4e   :  { %1025 = vmatpush3.bf16.msra.mxu1 %v1131_v1  ;;  %1004 = vmatprep.subr.bf16.mxu0 %v1132_v2 }
  0x4f   :  { %1026 = vmatprep.subr.bf16.mxu1 %v1133_v3 }
  0x51   :  { %1005 = vmatpush3.bf16.msra.mxu0 %v1134_v4 }
  0x52   :  { %1027 = vmatpush3.bf16.msra.mxu1 %v1135_v5  ;;  %1043 = vmatprep.subr.bf16.mxu0 %v1177_v13 }
  0x54   :  { %686 = vmatmul.mubr.bf16.vlgmr.msra.gmra.mrb[4].mxu0 %v870_v7 }
  0x55   :  { %726 = vmatmul.mubr.bf16.vlgmr.msra.gmra.mrb[4].mxu1 %v872_v10  ;;  %1044 = vmatpush3.bf16.msra.mxu0 %v1140_v12 }
  0x56   :  { %1045 = vmatprep.subr.bf16.mxu0 %v1177_v13  ;;  %1059 = vmatprep.mubr.msk.bf16.mxu0 %vm1178_vm0, %v1177_v13 }
  0x59   :  { %1046 = vmatpush3.bf16.msra.mxu0 %v1141_v14 }
  0x5a   :  { %1047 = vmatprep.subr.bf16.mxu0 %v1177_v13 }
  0x5d   :  { %1048 = vmatpush3.bf16.msra.mxu0 %v1142_v15 }
  0x5e   :  { %1049 = vmatprep.subr.bf16.mxu0 %v1177_v13 }
  0x61   :  { %1050 = vmatpush3.bf16.msra.mxu0 %v1143_v16 }
  0x62   :  { %1051 = vmatprep.subr.bf16.mxu0 %v1177_v13 }
  0x65   :  { %1052 = vmatpush3.bf16.msra.mxu0 %v1144_v17 }
  0x66   :  { %1053 = vmatprep.subr.bf16.mxu0 %v1177_v13 }
  0x69   :  { %1054 = vmatpush3.bf16.msra.mxu0 %v1145_v18 }
  0x6a   :  { %1055 = vmatprep.subr.bf16.mxu0 %v1177_v13 }
  0x6d   :  { %1056 = vmatpush3.bf16.msra.mxu0 %v1146_v19 }
  0x6e   :  { %1057 = vmatprep.subr.bf16.mxu0 %v1177_v13 }
  0x71   :  { %1058 = vmatpush3.bf16.msra.mxu0 %v1147_v20 }
 0x107   :  { %v962_v21 = vpop.f32.mrb[0].mxu0 }
 0x108   :  { %v984_v22 = vpop.f32.mrb[0].mxu1  ;;  %v963_v23 = vpop.f32.mrb[1].mxu0 }
 0x109   :  { %v985_v24 = vpop.f32.mrb[1].mxu1  ;;  %v964_v25 = vadd.f32 %v963_v23, %v962_v21  ;;  %v965_v27 = vpop.f32.mrb[2].mxu0 }
 0x10a   :  { %v986_v26 = vadd.f32 %v985_v24, %v984_v22  ;;  %v987_v28 = vpop.f32.mrb[2].mxu1  ;;  %v966_v29 = vpop.f32.mrb[3].mxu0 }
 0x10b   :  { %v988_v30 = vpop.f32.mrb[3].mxu1 }
 0x10c   :  { %v648_v31 = vadd.f32 %v986_v26, %v964_v25 }
 0x127   :  { %v1006_v32 = vpop.f32.mrb[4].mxu0 }
 0x128   :  { %v1028_v33 = vpop.f32.mrb[4].mxu1  ;;  %v1007_v34 = vpop.f32.mrb[5].mxu0 }
 0x129   :  { %v1029_v35 = vpop.f32.mrb[5].mxu1  ;;  %v1008_v36 = vadd.f32 %v1007_v34, %v1006_v32  ;;  %v1009_v38 = vpop.f32.mrb[6].mxu0 }
 0x12a   :  { %v1030_v37 = vadd.f32 %v1029_v35, %v1028_v33  ;;  %v1031_v39 = vpop.f32.mrb[6].mxu1  ;;  %v1010_v40 = vpop.f32.mrb[7].mxu0 }
 0x12b   :  { %v1032_v41 = vpop.f32.mrb[7].mxu1  ;;  %v688_v42 = vadd.f32 %v1008_v36, %v648_v31 }
 0x12d   :  { %v728_v43 = vadd.f32 %v1030_v37, %v688_v42 }
 0x12f   :  { %733 = vst [vmem:[%s1256_s3] sm:$0xff] %v728_v43  ;;  %v734_v44 = vrot.slane %v728_v43, 4  ;;  %v741_v45 = vmul.f32 %v728_v43, %v728_v43 }
 0x131   :  { %v735_v46 = vadd.f32 %v734_v44, %v728_v43  ;;  %v742_v47 = vrot.slane %v741_v45, 4 }
 0x133   :  { %v743_v48 = vadd.f32 %v742_v47, %v741_v45  ;;  %v736_v49 = vrot.slane %v735_v46, 2 }
 0x135   :  { %v744_v50 = vrot.slane %v743_v48, 2  ;;  %v737_v51 = vadd.f32 %v736_v49, %v735_v46 }
 0x137   :  { %v745_v52 = vadd.f32 %v744_v50, %v743_v48  ;;  %v738_v53 = vrot.slane %v737_v51, 1 }
 0x139   :  { %v739_v54 = vadd.f32 %v738_v53, %v737_v51  ;;  %v746_v55 = vrot.slane %v745_v52, 1 }
 0x13b   :  { %v740_v56 = vmul.f32 0.5, %v739_v54  ;;  %v747_v57 = vadd.f32 %v746_v55, %v745_v52 }
 0x13d   :  { %v748_v58 = vmul.f32 0.5, %v747_v57  ;;  %v749_v59 = vmul.f32 %v740_v56, %v740_v56  ;;  %v753_v62 = vsub.f32 %v728_v43, %v740_v56 }
 0x13f   :  { %v750_v60 = vsub.f32 %v748_v58, %v749_v59 }
 0x141   :  { %v751_v61 = vadd.f32 1e-05, %v750_v60 }
 0x143   :  { %1148 = vrsqrt.f32 %v751_v61 }
 0x14d   :  { %v1149_v63 = vpop.eup %1148 }
 0x14e   :  { %v754_v0 = vmul.f32 %v1149_v63, %v753_v62 }
 0x150   :  { %v755_v1 = vpack.c.bf16 %v754_v0, %v754_v0 }
 0x152   :  { %1060 = vmatmul.mubr.bf16.vlgmr.msra.gmra.mrb[8].mxu0 %v755_v1 }
 0x225   :  { %v854_v2 = vpop.f32.mrb[8].mxu0 }
 0x226   :  { %860 = vst [vmem:[%s1256_s3 + $0x8] sm:$0xff] %v854_v2  ;;  %v1061_v3 = vpop.f32.mrb[9].mxu0 }
 0x227   :  { %v857_v4 = vpop.f32.mrb[10].mxu0 }
 0x228   :  { %v1062_v5 = vpop.f32.mrb[11].mxu0 }
 0x229   :  { %865 = vsyncpa [#allocation3], 1 }

</bundles_post_ra>
